<compile_context>
chip_gen: v6e
topology: v6e:2x2x1
jax: 0.10.0
libtpu: 0.0.40
codegen_flags: <defaults>
</compile_context>

<pallas_src>
import functools
import math

import jax
import jax.numpy as jnp
from jax.experimental import pallas as pl
from jax.experimental.pallas import tpu as pltpu


def _fusion_layer_kernel(x_ref, y_ref, w_ref, o_ref, z_ref, *, d_model):
    """One (row-tile, layer) grid step.

    x_ref, y_ref : [tm, D]      (resident across the layer axis)
    w_ref        : [1, 2D, 2D]  (this layer's packed block weights, streamed)
    o_ref        : [tm, D]      (written on the last layer step)
    z_ref        : [tm, 2D] f32 VMEM scratch accumulator holding [x | y]
    """
    layer = pl.program_id(1)

    # Layer 0: initialize the fused [x | y] accumulator in f32.
    @pl.when(layer == 0)
    def _init():
        z_ref[...] = jnp.concatenate(
            [x_ref[...], y_ref[...]], axis=-1).astype(jnp.float32)

    # One fused block matmul per layer:
    #   z <- z + z @ [[W0, W3], [W1, W2]]   (== x,y <- x + x_, y + y_)
    w = w_ref[0]                                   # [2D, 2D], compute dtype
    z = z_ref[...]                                 # [tm, 2D], f32
    z = z + jnp.dot(z.astype(w.dtype), w, preferred_element_type=jnp.float32)
    z_ref[...] = z

    # Epilogue: return x + y.
    @pl.when(layer == pl.num_programs(1) - 1)
    def _finalize():
        o_ref[...] = (z[:, :d_model] + z[:, d_model:]).astype(o_ref.dtype)


def _pick_row_tile(m):
    for t in (512, 256, 128, 64, 32, 16, 8):
        if m % t == 0:
            return t
    return m


def pack_fusion_weights(w4):
    """[num_layers, 4, D, D] (W0..W3) -> packed block form [num_layers, 2D, 2D].

    [x_, y_] = [x | y] @ [[W0, W3], [W1, W2]].
    """
    w0, w1, w2, w3 = w4[:, 0], w4[:, 1], w4[:, 2], w4[:, 3]
    top = jnp.concatenate([w0, w3], axis=-1)       # [L, D, 2D]
    bot = jnp.concatenate([w1, w2], axis=-1)       # [L, D, 2D]
    return jnp.concatenate([top, bot], axis=-2)    # [L, 2D, 2D]


def fusion_layer(x, y, w_block):
    """x, y: [B, L, D] ; w_block: [num_layers, 2D, 2D] -> [B, L, D]."""
    B, L, D = x.shape
    num_layers, twoD, twoD2 = w_block.shape
    assert twoD == 2 * D and twoD2 == 2 * D

    M = B * L
    xf = x.reshape(M, D)
    yf = y.reshape(M, D)

    tm = _pick_row_tile(M)
    grid = (M // tm, num_layers)

    out_flat = pl.pallas_call(
        functools.partial(_fusion_layer_kernel, d_model=D),
        out_shape=jax.ShapeDtypeStruct((M, D), x.dtype),
        grid_spec=pltpu.PrefetchScalarGridSpec(
            num_scalar_prefetch=0,
            grid=grid,
            in_specs=[
                # x / y row tiles: same block across the layer axis -> DMA'd
                # once per row-tile, resident while layers stream.
                pl.BlockSpec((tm, D), lambda m, l: (m, 0)),
                pl.BlockSpec((tm, D), lambda m, l: (m, 0)),
                # One layer's packed weights per step (double-buffered).
                pl.BlockSpec((1, 2 * D, 2 * D), lambda m, l: (l, 0, 0)),
            ],
            out_specs=pl.BlockSpec((tm, D), lambda m, l: (m, 0)),
            scratch_shapes=[pltpu.VMEM((tm, 2 * D), jnp.float32)],
        ),
        compiler_params=pltpu.CompilerParams(
            dimension_semantics=("parallel", "arbitrary")),
    )(xf, yf, w_block)

    return out_flat.reshape(B, L, D)


def _reference(x, y, w4):
    """Pure-JAX reference: f32 residual stream, weight-dtype matmul operands."""
    cdt = w4.dtype
    xz = x.astype(jnp.float32)
    yz = y.astype(jnp.float32)
    for l in range(w4.shape[0]):
        w0, w1, w2, w3 = (w4[l, i] for i in range(4))
        xi = xz.astype(cdt)
        yi = yz.astype(cdt)
        x_ = (jnp.dot(xi, w0, preferred_element_type=jnp.float32)
              + jnp.dot(yi, w1, preferred_element_type=jnp.float32))
        y_ = (jnp.dot(yi, w2, preferred_element_type=jnp.float32)
              + jnp.dot(xi, w3, preferred_element_type=jnp.float32))
        xz, yz = xz + x_, yz + y_
    return (xz + yz).astype(x.dtype)


if __name__ == "__main__":
    # Small, FusionLayer-consistent shapes.
    B, L, d_model = 2, 8, 32
    d_state = 16            # kept for signature parity; unused by stand-in block
    num_fusion_layer = 2
    drop_rate = 0.1         # inference mode -> identity

    key = jax.random.PRNGKey(0)
    kx, ky, kw = jax.random.split(key, 3)

    # Residual stream stays f32; matmul operands (weights) are bf16.
    x = jax.random.normal(kx, (B, L, d_model), dtype=jnp.float32)
    y = jax.random.normal(ky, (B, L, d_model), dtype=jnp.float32)

    w4 = (jax.random.normal(kw, (num_fusion_layer, 4, d_model, d_model),
                            dtype=jnp.float32)
          / math.sqrt(d_model)).astype(jnp.bfloat16)

    w_block = pack_fusion_weights(w4)          # [num_layers, 2D, 2D], bf16

    out = fusion_layer(x, y, w_block)
    out = jax.block_until_ready(out)

    ref = _reference(x, y, w4)

    assert out.shape == (B, L, d_model)
    err = jnp.max(jnp.abs(out.astype(jnp.float32) - ref.astype(jnp.float32)))
    assert jnp.allclose(out.astype(jnp.float32), ref.astype(jnp.float32),
                        atol=5e-2, rtol=5e-2), f"mismatch vs reference: {err}"

    print("KERNEL_OK")
</pallas_src>

<mosaic_0001>
module attributes {stable_mosaic.version = 11 : i64} {
  func.func @_fusion_layer_kernel(%arg0: i32, %arg1: i32, %arg2: memref<16x32xf32, #tpu.memory_space<vmem>>, %arg3: memref<16x32xf32, #tpu.memory_space<vmem>>, %arg4: memref<1x64x64xbf16, #tpu.memory_space<vmem>>, %arg5: memref<16x32xf32, #tpu.memory_space<vmem>>, %arg6: memref<16x64xf32, #tpu.memory_space<vmem>>) attributes {dimension_semantics = [#tpu.dimension_semantics<parallel>, #tpu.dimension_semantics<arbitrary>], iteration_bounds = array<i64: 1, 2>, scalar_prefetch = 0 : i64, scratch_operands = 1 : i64, tpu.core_type = #tpu.core_type<tc>, window_params = [{transform_indices = @transform_0, window_bounds = array<i64: 16, 32>}, {transform_indices = @transform_1, window_bounds = array<i64: 16, 32>}, {transform_indices = @transform_2, window_bounds = array<i64: 1, 64, 64>}, {transform_indices = @transform_3, window_bounds = array<i64: 16, 32>}]} {
    %c0_i32 = arith.constant 0 : i32
    %0 = arith.cmpi eq, %arg1, %c0_i32 : i32
    %1 = arith.extui %0 : i1 to i32
    %c0_i32_0 = arith.constant 0 : i32
    %2 = arith.cmpi ne, %1, %c0_i32_0 : i32
    scf.if %2 {
      %c0_8 = arith.constant 0 : index
      %c0_9 = arith.constant 0 : index
      %13 = vector.load %arg2[%c0_8, %c0_9] : memref<16x32xf32, #tpu.memory_space<vmem>>, vector<16x32xf32>
      %c0_10 = arith.constant 0 : index
      %c0_11 = arith.constant 0 : index
      %14 = vector.load %arg3[%c0_10, %c0_11] : memref<16x32xf32, #tpu.memory_space<vmem>>, vector<16x32xf32>
      %15 = tpu.concatenate %13, %14 in 1 : vector<16x32xf32>, vector<16x32xf32> -> vector<16x64xf32>
      %c0_12 = arith.constant 0 : index
      %c0_13 = arith.constant 0 : index
      %16 = vector.load %arg6[%c0_12, %c0_13] : memref<16x64xf32, #tpu.memory_space<vmem>>, vector<16x64xf32>
      tpu.vector_store %arg6[%c0_12, %c0_13], %15 {strides = array<i32>} : memref<16x64xf32, #tpu.memory_space<vmem>>, vector<16x64xf32>,
    } else {
    }
    %c0 = arith.constant 0 : index
    %c0_1 = arith.constant 0 : index
    %c0_2 = arith.constant 0 : index
    %3 = vector.load %arg4[%c0, %c0_1, %c0_2] : memref<1x64x64xbf16, #tpu.memory_space<vmem>>, vector<1x64x64xbf16>
    %4 = vector.shape_cast %3 : vector<1x64x64xbf16> to vector<64x64xbf16>
    %c0_3 = arith.constant 0 : index
    %c0_4 = arith.constant 0 : index
    %5 = vector.load %arg6[%c0_3, %c0_4] : memref<16x64xf32, #tpu.memory_space<vmem>>, vector<16x64xf32>
    %6 = arith.truncf %5 : vector<16x64xf32> to vector<16x64xbf16>
    %cst = arith.constant dense<0.000000e+00> : vector<16x64xf32>
    %7 = tpu.matmul %6, %4, %cst {dimension_numbers = #tpu.dot_dimension_numbers<[1], [0], [0], [1], [0, 0, 1, 1], [], []>} : vector<16x64xbf16>, vector<64x64xbf16>, vector<16x64xf32> -> vector<16x64xf32>
    %8 = arith.addf %5, %7 : vector<16x64xf32>
    %c0_5 = arith.constant 0 : index
    %c0_6 = arith.constant 0 : index
    %9 = vector.load %arg6[%c0_5, %c0_6] : memref<16x64xf32, #tpu.memory_space<vmem>>, vector<16x64xf32>
    tpu.vector_store %arg6[%c0_5, %c0_6], %8 {strides = array<i32>} : memref<16x64xf32, #tpu.memory_space<vmem>>, vector<16x64xf32>,
    %c1_i32 = arith.constant 1 : i32
    %10 = arith.cmpi eq, %arg1, %c1_i32 : i32
    %11 = arith.extui %10 : i1 to i32
    %c0_i32_7 = arith.constant 0 : i32
    %12 = arith.cmpi ne, %11, %c0_i32_7 : i32
    scf.if %12 {
      %13 = vector.extract_strided_slice %8 {offsets = [0, 0], sizes = [16, 32], strides = [1, 1]} : vector<16x64xf32> to vector<16x32xf32>
      %14 = vector.extract_strided_slice %8 {offsets = [0, 32], sizes = [16, 32], strides = [1, 1]} : vector<16x64xf32> to vector<16x32xf32>
      %15 = arith.addf %13, %14 : vector<16x32xf32>
      %c0_8 = arith.constant 0 : index
      %c0_9 = arith.constant 0 : index
      %16 = vector.load %arg5[%c0_8, %c0_9] : memref<16x32xf32, #tpu.memory_space<vmem>>, vector<16x32xf32>
      tpu.vector_store %arg5[%c0_8, %c0_9], %15 {strides = array<i32>} : memref<16x32xf32, #tpu.memory_space<vmem>>, vector<16x32xf32>,
    } else {
    }
    return
  }
  func.func @transform_0(%arg0: i32, %arg1: i32) -> (i32, i32) {
    %c0_i32 = arith.constant 0 : i32
    %c0_i32_0 = arith.constant 0 : i32
    return %arg0, %c0_i32 : i32, i32
  }
  func.func @transform_1(%arg0: i32, %arg1: i32) -> (i32, i32) {
    %c0_i32 = arith.constant 0 : i32
    %c0_i32_0 = arith.constant 0 : i32
    return %arg0, %c0_i32 : i32, i32
  }
  func.func @transform_2(%arg0: i32, %arg1: i32) -> (i32, i32, i32) {
    %c0_i32 = arith.constant 0 : i32
    %c0_i32_0 = arith.constant 0 : i32
    %c0_i32_1 = arith.constant 0 : i32
    return %arg1, %c0_i32, %c0_i32_0 : i32, i32, i32
  }
  func.func @transform_3(%arg0: i32, %arg1: i32) -> (i32, i32) {
    %c0_i32 = arith.constant 0 : i32
    %c0_i32_0 = arith.constant 0 : i32
    return %arg0, %c0_i32 : i32, i32
  }
}

</mosaic_0001>

<bundles_post_ra>
// kernel: tpu_custom_call.1
= control target key start
LH: loop header
LB: loop body
LE: loop exit
PB: predicated region body
PF: predicated region fallthrough
CT: control target
= control target key end

     0   :  { %8 = vsyncpa [#allocation4], 0  ;;  %s952_s0 = inlined_call_operand.hbm [shape: f32[16,32], index: 0, kind: input, shape index: {}]   ;;  %s953_s1 = inlined_call_operand.hbm [shape: f32[16,32], index: 1, kind: input, shape index: {}]   ;;  %s954_s2 = inlined_call_operand.hbm [shape: bf16[2,64,64], index: 2, kind: input, shape index: {}]   ;;  %s955_s3 = inlined_call_operand.hbm [shape: f32[16,32], index: 3, kind: output, shape index: {}]  }
   0x1   :  { %9 = vsyncpa [#allocation7], 0 }
   0x2   :  { %10 = vsyncpa [#allocation5], 0  ;;  %s800_s12 = smov 0   ;;  %s802_s13 = smov 0  }
   0x3   :  { %s804_s14 = smov 0   ;;  %s806_s15 = smov 0  }
   0x4   :  { %s808_s16 = smov 0   ;;  %s810_s17 = smov 0  }
   0x5 LB: > { %s829_s18 = sadd.s32 4294967295, %s764_s17   ;;  %p94_p0 = scmp.ne.s32.totalorder %s752_s14, %s748_s13  ;;  %s764_s17 = sphi %s810_s17, %s16_s17   ;;  %s760_s16 = sphi %s808_s16, %s969_s16   ;;  %s756_s15 = sphi %s806_s15, %s968_s15   ;;  %s752_s14 = sphi %s804_s14, %s967_s14   ;;  %s748_s13 = sphi %s802_s13, %s966_s13   ;;  %s744_s12 = sphi %s800_s12, %s965_s12  }
   0x6   : > { %p95_p1 = scmp.eq.s32.totalorder %s764_s17, 0  ;;  %p100_p2 = scmp.ne.s32.totalorder %s748_s13, %s744_s12 }
   0x7   : > { %p956_p3 = scmp.eq.s32.totalorder %s829_s18, 0  ;;  %p461_p4 = scmp.ge.s32.totalorder %s764_s17, 1 }
   0x8   : > { %p96_p5 = por %p95_p1, %p94_p0  ;;  %p137_p6 = scmp.lt.s32.totalorder %s764_s17, 3 }
   0x9   : > { %p840_p7 = por %p956_p3, %p100_p2  ;;  %s766_s21 = smov [#allocation3]  }
   0xa   : > { %p844_p8 = pnand %p461_p4, %p137_p6  ;;  %s152_s22 = sshll.u32 %s766_s21, 4  ;;  %s153_s22 = int_to_ptr.vmem [resolvable:$true] %s152_s22 }
   0xb   : > { %p528_p11 = scmp.lt.s32.totalorder %s764_s17, 2  ;;  %s609_s25 = scalar_lea.vmem %s153_s22, 256 }
   0xc   : > { %p515_p9 = pneg %p844_p8  ;;  %p610_p0 = scmp.ne.s32.totalorder %s153_s22, %s609_s25 }
   0xd   : > { %p857_p12 = pnand %p528_p11, %p96_p5  ;;  %p617_p4 = scmp.lt.s32.totalorder %s153_s22, %s153_s22 }
   0xe   : > { %p852_p10 = pnand %p515_p9, %p956_p3  ;;  %p618_p6 = scmp.lt.s32.totalorder %s609_s25, %s609_s25 }
  0x10   : > { %p600_p13 = pneg %p852_p10  ;;  %p619_p9 = por %p618_p6, %p617_p4 }
  0x12   : > { %p612_p1 = pnand %p610_p0, %p600_p13 }
  0x14   : > { %p613_p2 = pneg %p612_p1 }
  0x16   : > { %p620_p3 = pnand %p619_p9, %p613_p2 }
  0x18   : > { %623 = shalt.err (!%p620_p3)
}
  0x19   : > { %s767_s26 = smov 128   ;;  %s768_s27 = smov 8  }
  0x1a   : > { %518 = dma.hbm_to_vmem [thread:$0]  (!%p852_p10), %s952_s0, 256, %s153_s22, [#allocation4], %s767_s26, %s767_s26, %s768_s27  }
  0x1b   : > { %s769_s30 = smov [#allocation6]  }
  0x1c   : > { %s168_s4 = sshll.u32 %s769_s30, 4  ;;  %s169_s4 = int_to_ptr.vmem [resolvable:$true] %s168_s4 }
  0x1d   : > { %s635_s5 = scalar_lea.vmem %s169_s4, 256  ;;  %p643_p1 = scmp.lt.s32.totalorder %s169_s4, %s169_s4 }
  0x1e   : > { %p636_p5 = scmp.ne.s32.totalorder %s169_s4, %s635_s5  ;;  %p644_p3 = scmp.lt.s32.totalorder %s635_s5, %s635_s5 }
  0x20   : > { %p638_p11 = pnand %p636_p5, %p600_p13  ;;  %p645_p2 = por %p644_p3, %p643_p1 }
  0x22   : > { %p639_p0 = pneg %p638_p11 }
  0x24   : > { %p646_p4 = pnand %p645_p2, %p639_p0 }
  0x26   : > { %649 = shalt.err (!%p646_p4)
}
  0x27   : > { %521 = dma.hbm_to_vmem [thread:$0]  (!%p852_p10), %s953_s1, 256, %s169_s4, [#allocation7], %s767_s26, %s767_s26, %s768_s27  }
  0x28   : > { %s25_s8 = sadd.s32 1, %s760_s16  ;;  %s87_s9 = sadd.s32 1, %s752_s14 }
  0x29   : > { %p26_p13 = scmp.ge.s32.totalorder %s25_s8, 2  ;;  %s182_s10 = sand.u32 1, %s764_s17  }
  0x2a   : > { %s184_s11 = sand.u32 1, %s752_s14   ;;  %s483_s21 = sshll.u32 %s760_s16, 9 }
  0x2b   : > { %s971_s8 = smov (%p26_p13, %s25_s8), 0  ;;  %s465_s12 = sshll.u32 %s184_s11, 5 }
  0x2c   : > { %s84_s22 = ssub.s32 %s760_s16, %s971_s8  ;;  %s192_s28 = scalar_lea.hbm %s954_s2, %s483_s21 }
  0x2d   : > { %p85_p6 = scmp.eq.s32.totalorder %s84_s22, 0  ;;  %s186_s29 = scalar_lea.vmem [#allocation8], %s465_s12 }
  0x2e   : > { %s193_s30 = sshll.u32 %s186_s29, 4  ;;  %s183_s27 = scalar_lea.sflag [#allocation4], %s182_s10  ;;  %s194_s30 = int_to_ptr.vmem [resolvable:$true] %s193_s30 }
  0x2f   : > { %s892_s26 = scalar_select %p85_p6, %s752_s14, %s87_s9  }
  0x30   : > { %p652_p10 = pneg %p857_p12  ;;  %s663_s4 = scalar_lea.vmem %s194_s30, 512 }
  0x31   : > { %p664_p9 = scmp.ne.s32.totalorder %s194_s30, %s663_s4  ;;  %s770_s5 = smov [#allocation8]  }
  0x32   : > { %s668_s6 = sshll.u32 %s770_s5, 4  ;;  %s669_s6 = int_to_ptr.vmem [resolvable:$false] %s668_s6 }
  0x33   : > { %p666_p5 = pnand %p664_p9, %p652_p10  ;;  %s670_s7 = scalar_lea.vmem %s669_s6, 1024 }
  0x34   : > { %p671_p0 = scmp.lt.s32.totalorder %s194_s30, %s669_s6  ;;  %p672_p1 = scmp.lt.s32.totalorder %s670_s7, %s663_s4 }
  0x35   : > { %p667_p11 = pneg %p666_p5 }
  0x36   : > { %p673_p3 = por %p672_p1, %p671_p0 }
  0x38   : > { %p674_p2 = pnand %p673_p3, %p667_p11 }
  0x3a   : > { %677 = shalt.err (!%p674_p2)
}
  0x3b   : > { %s771_s11 = smov 64   ;;  %s772_s9 = smov 4  }
  0x3c   : > { %525 = dma.hbm_to_vmem [thread:$0]  (!%p857_p12), %s192_s28, 512, %s194_s30, %s183_s27, %s771_s11, %s771_s11, %s772_s9  }
  0x3d   : > { %205 = sbr.rel (%p844_p8) target bundleno = 558 (0x22e), region = 32  ;;  %p961_p4 = scmp.eq.s32.totalorder (!%p844_p8), %s829_s18, 0 }
  0x42   : > { %727 = dma.done.wait (%p961_p4), [#allocation4], 256   ;;  %p962_p13 = pmov %p961_p4 }
  0x43   : > { %p963_p6 = pmov %p961_p4 }
  0x44   : > { %729 = vsyncadd (%p962_p13), [#allocation4], 4294967040 }
  0x45   : > { %731 = dma.done.wait (%p963_p6), [#allocation7], 256   ;;  %p964_p10 = pmov %p961_p4 }
  0x46   : > { %s215_s24 = sand.u32 1, %s829_s18   ;;  %s217_s10 = sand.u32 1, %s748_s13  }
  0x47   : > { %733 = vsyncadd (%p964_p10), [#allocation7], 4294967040  ;;  %s471_s12 = sshll.u32 %s217_s10, 5  ;;  %s216_s20 = scalar_lea.sflag [#allocation4], %s215_s24 }
  0x48   : > { %s910_s21 = scalar_lea.vmem [#allocation8], %s471_s12 }
  0x49   : > { %735 = dma.done.wait (%p840_p7), %s216_s20, 512  }
  0x4a   : > { %737 = vsyncadd (%p840_p7), %s216_s20, 4294966784  ;;  %p472_p8 = scmp.ne.s32.totalorder %s756_s15, 0 }
  0x4b   : > { %s773_s22 = smov (!%p472_p8), 32  }
  0x4c   : > { %244 = sbr.rel (%p472_p8) target bundleno = 203 (0xcb), region = 48 }
  0x51   : > { %v247_v0 = vld [vmem:[#allocation6] sm:$0xff]  ;;  %v248_v1 = vld [vmem:[#allocation6 + $0x8] sm:$0xff]  ;;  %vm257_vm0 = vcmask 261120   ;;  %v245_v2 = vld [vmem:[#allocation3] sm:$0xff]  ;;  %vm260_vm1 = vcmask 523264  }
  0x52   : > { %251 = vrot.lane.b32.xlu0 %v247_v0, %s773_s22  ;;  %v246_v5 = vld [vmem:[#allocation3 + $0x8] sm:$0xff] }
  0x56   : > { %253 = vrot.lane.b32.xlu0 %v248_v1, %s773_s22 }
  0xc4   : > { %v252_v3 = vpop.permute.xlu0 %251 }
  0xc5   : > { %v258_v4 = vsel %vm257_vm0, %v245_v2, %v252_v3 }
  0xc6   : > { %261 = vst.msk [vmem:[#allocation2] sm:$0xff] %vm260_vm1, %v258_v4 }
  0xc8   : > { %v254_v6 = vpop.permute.xlu0 %253 }
  0xc9   : > { %v259_v7 = vsel %vm257_vm0, %v246_v5, %v254_v6 }
  0xca   : > { %262 = vst.msk [vmem:[#allocation2 + $0x8] sm:$0xff] %vm260_vm1, %v259_v7 }
  0xcb PF: > { %v594_v8 = vld [vmem:[%s910_s21 + $0x18] sm:$0xff]   ;;  %v774_v9 = vmov 0.0   ;;  %v595_v10 = vld [vmem:[%s910_s21 + $0x10] sm:$0xff]   ;;  %vm775_vm2 = vmmov 0   ;;  %v596_v11 = vld [vmem:[%s910_s21 + $0x8] sm:$0xff]   ;;  %vm298_vm3 = vcmask 523264  }
  0xcc   : > { %489 = vmatprep.subr.bf16.mxu0 %v774_v9  ;;  %497 = vmatprep.mubr.msk.bf16.mxu0 %vm775_vm2, %v774_v9  ;;  %v597_v12 = vld [vmem:[%s910_s21] sm:$0xff]   ;;  %p478_p7 = scmp.ne.s32.totalorder %s756_s15, 1 }
  0xcd   : > { %490 = vmatpush3.bf16.msra.mxu0 %v594_v8  ;;  %v271_v13 = vld [vmem:[#allocation2] sm:$0xff]  ;;  %s776_s19 = smov (!%p478_p7), 96  }
  0xce   : > { %491 = vmatprep.subr.bf16.mxu0 %v774_v9 }
  0xd1   : > { %492 = vmatpush3.bf16.msra.mxu0 %v595_v10  ;;  %v272_v14 = vld [vmem:[#allocation2 + $0x8] sm:$0xff] }
  0xd2   : > { %493 = vmatprep.subr.bf16.mxu0 %v774_v9  ;;  %v273_v15 = vpack.c.bf16 %v272_v14, %v271_v13 }
  0xd5   : > { %494 = vmatpush3.bf16.msra.mxu0 %v596_v11 }
  0xd6   : > { %495 = vmatprep.subr.bf16.mxu0 %v774_v9 }
  0xd9   : > { %496 = vmatpush3.bf16.msra.mxu0 %v597_v12 }
  0xdc   : > { %498 = vmatmul.mubr.msk.bf16.vlgmr.msra.gmra.mxu0 %vm298_vm3, %v273_v15 }
 0x19c   : > { %v336_v16 = vpop.f32.mrf.mxu0 }
 0x19d   : > { %v343_v17 = vadd.f32 %v336_v16, %v271_v13 }
 0x19e   : > { %v499_v18 = vpop.f32.mrf.mxu0 }
 0x19f   : > { %345 = vst.msk [vmem:[#allocation2] sm:$0xff] %vm298_vm3, %v343_v17  ;;  %350 = sbr.rel (%p478_p7) target bundleno = 542 (0x21e), region = 52 }
 0x1a0   : > { %v339_v19 = vpop.f32.mrf.mxu0 }
 0x1a1   : > { %v344_v20 = vadd.f32 %v339_v19, %v272_v14 }
 0x1a2   : > { %v500_v21 = vpop.f32.mrf.mxu0 }
 0x1a3   : > { %346 = vst.msk [vmem:[#allocation2 + $0x8] sm:$0xff] %vm298_vm3, %v344_v20 }
 0x1a4   : > { %353 = vrot.lane.b32.xlu0 %v343_v17, %s776_s19  ;;  %vm361_vm4 = vcmask 261120  }
 0x1a8   : > { %355 = vrot.lane.b32.xlu0 %v344_v20, %s776_s19 }
 0x216   : > { %v354_v22 = vpop.permute.xlu0 %353 }
 0x217   : > { %v359_v23 = vadd.f32 %v354_v22, %v343_v17 }
 0x219   : > { %362 = vst.msk [vmem:[#allocation9] sm:$0xff] %vm361_vm4, %v359_v23 }
 0x21a   : > { %v356_v24 = vpop.permute.xlu0 %355 }
 0x21b   : > { %v360_v25 = vadd.f32 %v356_v24, %v344_v20 }
 0x21d   : > { %363 = vst.msk [vmem:[#allocation9 + $0x8] sm:$0xff] %vm361_vm4, %v360_v25 }
 0x21e PF: > { %p531_p12 = scmp.eq.s32.totalorder %s829_s18, 1  ;;  %s777_s23 = smov [#allocation9]  }
 0x21f   : > { %s373_s25 = sshll.u32 %s777_s23, 4  ;;  %s374_s25 = int_to_ptr.vmem [resolvable:$true] %s373_s25 }
 0x220   : > { %s678_s28 = scalar_lea.vmem %s374_s25, 256  ;;  %p685_p0 = scmp.lt.s32.totalorder %s374_s25, %s374_s25 }
 0x221   : > { %p679_p9 = scmp.ne.s32.totalorder %s374_s25, %s678_s28  ;;  %p686_p1 = scmp.lt.s32.totalorder %s678_s28, %s678_s28 }
 0x223   : > { %p680_p5 = pnand %p679_p9, %p531_p12  ;;  %p687_p3 = por %p686_p1, %p685_p0 }
 0x225   : > { %p681_p11 = pneg %p680_p5 }
 0x227   : > { %p688_p2 = pnand %p687_p3, %p681_p11 }
 0x229   : > { %691 = shalt.err (!%p688_p2)
}
 0x22a   : > { %s778_s15 = smov 128   ;;  %s779_s29 = smov 8  }
 0x22b   : > { %512 = dma.vmem_to_hbm [thread:$0]  (%p531_p12), %s374_s25, 256, %s955_s3, [#allocation5], %s778_s15, %s778_s15, %s779_s29  }
 0x22c   : > { %739 = dma.done.wait (%p531_p12), [#allocation5], 256  }
 0x22d   : > { %741 = vsyncadd (%p531_p12), [#allocation5], 4294967040 }
 0x22e PF: > { %s16_s17 = sadd.s32 1, %s764_s17   ;;  %s965_s12 = smov %s748_s13 }
 0x22f   : > { %p13_p4 = scmp.ge.s32.totalorder %s16_s17, 4   ;;  %s966_s13 = smov %s752_s14 }
 0x230   : > { %s967_s14 = smov %s892_s26  ;;  %s968_s15 = smov %s760_s16 }
 0x231   : > { %s969_s16 = smov %s971_s8  ;;  %15 = sbr.rel (!%p13_p4) target bundleno = 5 (0x5), region = 87 }
 0x236   :  { %389 = vsyncpa [#allocation4], 1 }
 0x237   :  { %391 = vsyncpa [#allocation4 + $0x1], 1 }
 0x238   :  { %392 = vsyncpa [#allocation7], 1 }
 0x239   :  { %393 = vsyncpa [#allocation5], 1 }
 0x23a   :  { %395 = vsyncpa [#allocation5 + $0x1], 1 }

</bundles_post_ra>
